<compile_context>
chip_gen: v7x
topology: tpu7x:2x2x1
jax: 0.10.0
libtpu: 0.0.40
codegen_flags: <defaults>
</compile_context>

<pallas_src>
import functools

import jax
import jax.numpy as jnp
import numpy as np
from jax import lax
from jax.experimental import pallas as pl
from jax.experimental.pallas import tpu as pltpu


# ----------------------------------------------------------------------------
# Per-generation knobs.
# ----------------------------------------------------------------------------
def _device_kind():
    try:
        return jax.devices()[0].device_kind.lower()
    except Exception:
        return ""


def _chip_flags():
    kind = _device_kind()
    is_v7 = "v7" in kind
    is_v5_or_older = any(t in kind for t in ("v5", "v4", "v3", "v2"))
    # EUP has bf16 on v6e/v7x (~2x exp throughput); v5e EUP is f32-only.
    exp_dtype = jnp.float32 if is_v5_or_older else jnp.bfloat16
    # v7x: 64 MiB physical VMEM; v5e/v6e: 128 MiB.  Leave headroom.
    vmem_limit = (48 << 20) if is_v7 else (96 << 20)
    return exp_dtype, vmem_limit, is_v7


def _cparams(semantics, vmem_limit):
    return pltpu.CompilerParams(dimension_semantics=semantics,
                                vmem_limit_bytes=vmem_limit)


def _pick_tile(dim, target, multiple=8):
    """Largest tile <= target that divides `dim` (multiple of `multiple`); else full dim
    (and fail loudly instead of silently producing huge full-dim blocks)."""
    if dim <= target:
        return dim
    t = (target // multiple) * multiple
    while t >= multiple:
        if dim % t == 0:
            return t
        t -= multiple
    if dim > 4 * target:
        raise ValueError(
            f"no row tile <= {target} divides dim={dim}; pad the sequence to a multiple of 8")
    return dim


def _head_group(heads, head_dim):
    """Smallest g dividing `heads` with (g*head_dim) % 128 == 0 (lane-aligned column
    blocks of the (B,N,C) arrays); fall back to all heads (block spans full C)."""
    for g in range(1, heads + 1):
        if heads % g == 0 and (g * head_dim) % 128 == 0:
            return g
    return heads


# ----------------------------------------------------------------------------
# Kernel 1: fused q/k/v projection.
#   x2_ref/x_ref: (tm, C) f32 (cast to bf16 in-kernel: one HBM read, no wrapper cast pass)
#   w*_ref: (C, C) bf16 (resident), b*_ref: (1, C) f32
#   q/k/v_ref: (tm, C) bf16, lane-dense C-wide stores, full-C contraction.
# ----------------------------------------------------------------------------
def _qkv_kernel(x2_ref, x_ref, wq_ref, bq_ref, wk_ref, bk_ref, wv_ref, bv_ref,
                q_ref, k_ref, v_ref):
    x2b = x2_ref[...].astype(jnp.bfloat16)
    xb = x_ref[...].astype(jnp.bfloat16)
    q_ref[...] = (jnp.dot(x2b, wq_ref[...], preferred_element_type=jnp.float32)
                  + bq_ref[...]).astype(q_ref.dtype)
    k_ref[...] = (jnp.dot(xb, wk_ref[...], preferred_element_type=jnp.float32)
                  + bk_ref[...]).astype(k_ref.dtype)
    v_ref[...] = (jnp.dot(xb, wv_ref[...], preferred_element_type=jnp.float32)
                  + bv_ref[...]).astype(v_ref.dtype)


def _qkv_proj(x2, x, wq, bq, wk, bk, wv, bv, tm, vmem_limit):
    B, N, C = x.shape
    row_spec = pl.BlockSpec((pl.Squeezed(), tm, C), lambda b, i: (b, i, 0))
    w_spec = pl.BlockSpec((C, C), lambda b, i: (0, 0))
    b_spec = pl.BlockSpec((1, C), lambda b, i: (0, 0))
    out = jax.ShapeDtypeStruct((B, N, C), jnp.bfloat16)
    return pl.pallas_call(
        _qkv_kernel,
        out_shape=(out, out, out),
        grid=(B, N // tm),
        in_specs=[row_spec, row_spec, w_spec, b_spec, w_spec, b_spec, w_spec, b_spec],
        out_specs=(row_spec, row_spec, row_spec),
        compiler_params=_cparams(("parallel", "parallel"), vmem_limit),
    )(x2, x, wq, bq, wk, bk, wv, bv)


# ----------------------------------------------------------------------------
# Kernel 2: attention for one (batch, head-group, query-tile).
#   q_ref: (tq, g*hd) bf16 (pre-scaled), k_ref/v_ref: (N, g*hd) bf16 (resident over i)
#   o_ref: (tq, g*hd) bf16 -> head-major columns of (B, N, C)
#   a_ref: (g, tq, N) bf16 -> heads [gi*g, (gi+1)*g) of (B, H, N, N)
# ----------------------------------------------------------------------------
def _attn_kernel(q_ref, k_ref, v_ref, o_ref, a_ref, *, g, hd, exp_dtype):
    o_parts = []
    for j in range(g):                                       # g is small & static
        qj = q_ref[:, j * hd:(j + 1) * hd]                   # (tq, hd)
        kj = k_ref[:, j * hd:(j + 1) * hd]                   # (N,  hd)
        vj = v_ref[:, j * hd:(j + 1) * hd]                   # (N,  hd)
        s = lax.dot_general(qj, kj, (((1,), (1,)), ((), ())),
                            preferred_element_type=jnp.float32)          # (tq, N)
        m = jnp.max(s, axis=-1, keepdims=True)
        e = jnp.exp((s - m).astype(exp_dtype))                           # EUP exp
        denom = jnp.sum(e.astype(jnp.float32), axis=-1, keepdims=True)
        inv = pl.reciprocal(denom, approx=False)                         # exact norm
        p_bf = (e * inv).astype(jnp.bfloat16)
        a_ref[j] = p_bf                                                  # bf16 attn tile
        o_parts.append(jnp.dot(p_bf, vj, preferred_element_type=jnp.float32))
    o_ref[...] = jnp.concatenate(o_parts, axis=-1).astype(o_ref.dtype)


def _attention(q, k, v, heads, tq, g, exp_dtype, vmem_limit):
    B, N, C = q.shape
    hd = C // heads
    G = heads // g
    gw = g * hd
    kernel = functools.partial(_attn_kernel, g=g, hd=hd, exp_dtype=exp_dtype)
    o, attn = pl.pallas_call(
        kernel,
        out_shape=(jax.ShapeDtypeStruct((B, N, C), jnp.bfloat16),
                   jax.ShapeDtypeStruct((B, heads, N, N), jnp.bfloat16)),
        grid=(B, G, N // tq),
        in_specs=[
            pl.BlockSpec((pl.Squeezed(), tq, gw), lambda b, gi, i: (b, i, gi)),
            pl.BlockSpec((pl.Squeezed(), N, gw), lambda b, gi, i: (b, 0, gi)),  # K resident over i
            pl.BlockSpec((pl.Squeezed(), N, gw), lambda b, gi, i: (b, 0, gi)),  # V resident over i
        ],
        out_specs=(
            pl.BlockSpec((pl.Squeezed(), tq, gw), lambda b, gi, i: (b, i, gi)),
            pl.BlockSpec((pl.Squeezed(), g, tq, N), lambda b, gi, i: (b, gi, i, 0)),
        ),
        # No reduction axis: all three axes are parallel (K/V residency comes from the
        # constant index_map over i, not the semantics tag) -> even split on v7x's 2 TCs.
        compiler_params=_cparams(("parallel", "parallel", "parallel"), vmem_limit),
    )(q, k, v)
    return o, attn


# ----------------------------------------------------------------------------
# Kernel 3: output projection.  o is already head-major (B,N,C), so this is a single
# (tm,C)x(C,C) matmul with full-C contraction and no head grid axis.
# ----------------------------------------------------------------------------
def _out_proj_kernel(o_ref, w_ref, b_ref, y_ref):
    y_ref[...] = (jnp.dot(o_ref[...], w_ref[...], preferred_element_type=jnp.float32)
                  + b_ref[...]).astype(y_ref.dtype)


def _out_proj(o, wp, bp, tm, vmem_limit):
    B, N, C = o.shape
    return pl.pallas_call(
        _out_proj_kernel,
        out_shape=jax.ShapeDtypeStruct((B, N, C), jnp.float32),
        grid=(B, N // tm),
        in_specs=[
            pl.BlockSpec((pl.Squeezed(), tm, C), lambda b, i: (b, i, 0)),
            pl.BlockSpec((C, C), lambda b, i: (0, 0)),
            pl.BlockSpec((1, C), lambda b, i: (0, 0)),
        ],
        out_specs=pl.BlockSpec((pl.Squeezed(), tm, C), lambda b, i: (b, i, 0)),
        compiler_params=_cparams(("parallel", "parallel"), vmem_limit),
    )(o, wp, bp)


# ----------------------------------------------------------------------------
# Full module forward.
# ----------------------------------------------------------------------------
def attention_forward(x, x2, params, heads):
    B, N, C = x.shape
    assert C % heads == 0
    hd = C // heads
    scale = hd ** (-0.5)
    exp_dtype, vmem_limit, is_v7 = _chip_flags()

    # One-time weight prep (tiny vs the matmuls): y = z @ W.T + b -> pre-transpose,
    # fold 1/sqrt(hd) into Wq/bq in f32, then cast to bf16 for the MXU.
    wq_t = (params["wq"] * scale).T.astype(jnp.bfloat16)
    bq_r = (params["bq"] * scale).reshape(1, C).astype(jnp.float32)
    wk_t = params["wk"].T.astype(jnp.bfloat16)
    bk_r = params["bk"].reshape(1, C).astype(jnp.float32)
    wv_t = params["wv"].T.astype(jnp.bfloat16)
    bv_r = params["bv"].reshape(1, C).astype(jnp.float32)
    wp_t = params["wp"].T.astype(jnp.bfloat16)
    bp_r = params["bp"].reshape(1, C).astype(jnp.float32)

    # Tile / group selection (per TPU generation).
    tm = _pick_tile(N, 512)                     # streaming row tile (proj / out-proj)
    if N <= 2048:
        tq_target = 512
    elif is_v7 and N >= 4096:
        tq_target = 128                         # v7x: 64 MiB VMEM
    else:
        tq_target = 256
    tq = _pick_tile(N, tq_target)
    g = _head_group(heads, hd)                  # heads per attention block (lane-aligned)

    # 1) fused q/k/v projections (x / x2 each read from HBM exactly once).
    q, k, v = _qkv_proj(x2, x, wq_t, bq_r, wk_t, bk_r, wv_t, bv_r, tm, vmem_limit)

    # 2) attention.  attn_drop = identity (eval).  attn emitted in bf16.
    o, attn = _attention(q, k, v, heads, tq, g, exp_dtype, vmem_limit)
    # TODO(synk): add a return_attn=False flash-softmax variant (KV-tiled, no (B,H,N,N)
    # writeback) for callers that only need y.

    # 3) output projection.  proj_drop = identity (eval).
    y = _out_proj(o, wp_t, bp_r, tm, vmem_limit)
    return y, attn


# ----------------------------------------------------------------------------
# Pure-JAX reference for verification.
# ----------------------------------------------------------------------------
def reference_forward(x, x2, params, heads):
    B, N, C = x.shape
    hd = C // heads
    scale = hd ** (-0.5)

    def lin(z, w, b):
        return z @ w.T + b

    def heads_view(z):
        return z.reshape(B, N, heads, hd).transpose(0, 2, 1, 3)

    q = heads_view(lin(x2, params["wq"], params["bq"]))
    k = heads_view(lin(x, params["wk"], params["bk"]))
    v = heads_view(lin(x, params["wv"], params["bv"]))
    s = jnp.einsum("bhqd,bhkd->bhqk", q, k) * scale
    attn = jax.nn.softmax(s, axis=-1)
    o = jnp.einsum("bhqk,bhkd->bhqd", attn, v)
    o = o.transpose(0, 2, 1, 3).reshape(B, N, C)
    y = lin(o, params["wp"], params["bp"])
    return y, attn


if __name__ == "__main__":
    # Small shapes consistent with the module: dim must be divisible by heads.
    B, N, C, HEADS = 2, 16, 32, 4

    key = jax.random.PRNGKey(0)
    ks = jax.random.split(key, 10)
    params = {
        "wq": jax.random.normal(ks[0], (C, C), jnp.float32) * 0.05,
        "bq": jax.random.normal(ks[1], (C,), jnp.float32) * 0.05,
        "wk": jax.random.normal(ks[2], (C, C), jnp.float32) * 0.05,
        "bk": jax.random.normal(ks[3], (C,), jnp.float32) * 0.05,
        "wv": jax.random.normal(ks[4], (C, C), jnp.float32) * 0.05,
        "bv": jax.random.normal(ks[5], (C,), jnp.float32) * 0.05,
        "wp": jax.random.normal(ks[6], (C, C), jnp.float32) * 0.05,
        "bp": jax.random.normal(ks[7], (C,), jnp.float32) * 0.05,
    }
    x = jax.random.normal(ks[8], (B, N, C), jnp.float32)
    x2 = jax.random.normal(ks[9], (B, N, C), jnp.float32)

    y, attn = attention_forward(x, x2, params, HEADS)
    y = jax.block_until_ready(y)
    attn = jax.block_until_ready(attn)

    y_ref, attn_ref = reference_forward(x, x2, params, HEADS)
    assert y.shape == (B, N, C) and attn.shape == (B, HEADS, N, N)
    # bf16 MXU operands / bf16 attn output (with f32 accumulation) -> bf16-level tolerances.
    np.testing.assert_allclose(np.asarray(y), np.asarray(y_ref), atol=2e-2, rtol=2e-2)
    np.testing.assert_allclose(np.asarray(attn, dtype=np.float32),
                               np.asarray(attn_ref), atol=2e-2, rtol=2e-2)

    print("KERNEL_OK")
</pallas_src>

<mosaic_0001>
module attributes {stable_mosaic.version = 11 : i64} {
  func.func @_qkv_kernel(%arg0: i32, %arg1: i32, %arg2: memref<1x16x32xf32, #tpu.memory_space<vmem>>, %arg3: memref<1x16x32xf32, #tpu.memory_space<vmem>>, %arg4: memref<32x32xbf16, #tpu.memory_space<vmem>>, %arg5: memref<1x32xf32, #tpu.memory_space<vmem>>, %arg6: memref<32x32xbf16, #tpu.memory_space<vmem>>, %arg7: memref<1x32xf32, #tpu.memory_space<vmem>>, %arg8: memref<32x32xbf16, #tpu.memory_space<vmem>>, %arg9: memref<1x32xf32, #tpu.memory_space<vmem>>, %arg10: memref<1x16x32xbf16, #tpu.memory_space<vmem>>, %arg11: memref<1x16x32xbf16, #tpu.memory_space<vmem>>, %arg12: memref<1x16x32xbf16, #tpu.memory_space<vmem>>) attributes {dimension_semantics = [#tpu.dimension_semantics<parallel>, #tpu.dimension_semantics<parallel>], iteration_bounds = array<i64: 2, 1>, scalar_prefetch = 0 : i64, scratch_operands = 0 : i64, tpu.core_type = #tpu.core_type<tc>, window_params = [{transform_indices = @transform_0, window_bounds = array<i64: 1, 16, 32>}, {transform_indices = @transform_1, window_bounds = array<i64: 1, 16, 32>}, {pipeline_mode = #tpu.pipeline_mode<synchronous>, transform_indices = @transform_2, window_bounds = array<i64: 32, 32>}, {pipeline_mode = #tpu.pipeline_mode<synchronous>, transform_indices = @transform_3, window_bounds = array<i64: 1, 32>}, {pipeline_mode = #tpu.pipeline_mode<synchronous>, transform_indices = @transform_4, window_bounds = array<i64: 32, 32>}, {pipeline_mode = #tpu.pipeline_mode<synchronous>, transform_indices = @transform_5, window_bounds = array<i64: 1, 32>}, {pipeline_mode = #tpu.pipeline_mode<synchronous>, transform_indices = @transform_6, window_bounds = array<i64: 32, 32>}, {pipeline_mode = #tpu.pipeline_mode<synchronous>, transform_indices = @transform_7, window_bounds = array<i64: 1, 32>}, {transform_indices = @transform_8, window_bounds = array<i64: 1, 16, 32>}, {transform_indices = @transform_9, window_bounds = array<i64: 1, 16, 32>}, {transform_indices = @transform_10, window_bounds = array<i64: 1, 16, 32>}]} {
    %c0 = arith.constant 0 : index
    %c0_0 = arith.constant 0 : index
    %c0_1 = arith.constant 0 : index
    %0 = vector.load %arg2[%c0, %c0_0, %c0_1] : memref<1x16x32xf32, #tpu.memory_space<vmem>>, vector<1x16x32xf32>
    %1 = vector.shape_cast %0 : vector<1x16x32xf32> to vector<16x32xf32>
    %2 = arith.truncf %1 : vector<16x32xf32> to vector<16x32xbf16>
    %c0_2 = arith.constant 0 : index
    %c0_3 = arith.constant 0 : index
    %c0_4 = arith.constant 0 : index
    %3 = vector.load %arg3[%c0_2, %c0_3, %c0_4] : memref<1x16x32xf32, #tpu.memory_space<vmem>>, vector<1x16x32xf32>
    %4 = vector.shape_cast %3 : vector<1x16x32xf32> to vector<16x32xf32>
    %5 = arith.truncf %4 : vector<16x32xf32> to vector<16x32xbf16>
    %c0_5 = arith.constant 0 : index
    %c0_6 = arith.constant 0 : index
    %6 = vector.load %arg4[%c0_5, %c0_6] : memref<32x32xbf16, #tpu.memory_space<vmem>>, vector<32x32xbf16>
    %cst = arith.constant dense<0.000000e+00> : vector<16x32xf32>
    %7 = tpu.matmul %2, %6, %cst {dimension_numbers = #tpu.dot_dimension_numbers<[1], [0], [0], [1], [0, 0, 1, 1], [], []>} : vector<16x32xbf16>, vector<32x32xbf16>, vector<16x32xf32> -> vector<16x32xf32>
    %c0_7 = arith.constant 0 : index
    %c0_8 = arith.constant 0 : index
    %8 = vector.load %arg5[%c0_7, %c0_8] : memref<1x32xf32, #tpu.memory_space<vmem>>, vector<1x32xf32>
    %9 = vector.broadcast %8 : vector<1x32xf32> to vector<16x32xf32>
    %10 = arith.addf %7, %9 : vector<16x32xf32>
    %11 = arith.truncf %10 : vector<16x32xf32> to vector<16x32xbf16>
    %c0_9 = arith.constant 0 : index
    %c0_10 = arith.constant 0 : index
    %c0_11 = arith.constant 0 : index
    %12 = vector.load %arg10[%c0_9, %c0_10, %c0_11] : memref<1x16x32xbf16, #tpu.memory_space<vmem>>, vector<1x16x32xbf16>
    %13 = vector.shape_cast %12 : vector<1x16x32xbf16> to vector<16x32xbf16>
    %14 = vector.shape_cast %11 : vector<16x32xbf16> to vector<1x16x32xbf16>
    tpu.vector_store %arg10[%c0_9, %c0_10, %c0_11], %14 {strides = array<i32>} : memref<1x16x32xbf16, #tpu.memory_space<vmem>>, vector<1x16x32xbf16>,
    %c0_12 = arith.constant 0 : index
    %c0_13 = arith.constant 0 : index
    %15 = vector.load %arg6[%c0_12, %c0_13] : memref<32x32xbf16, #tpu.memory_space<vmem>>, vector<32x32xbf16>
    %cst_14 = arith.constant dense<0.000000e+00> : vector<16x32xf32>
    %16 = tpu.matmul %5, %15, %cst_14 {dimension_numbers = #tpu.dot_dimension_numbers<[1], [0], [0], [1], [0, 0, 1, 1], [], []>} : vector<16x32xbf16>, vector<32x32xbf16>, vector<16x32xf32> -> vector<16x32xf32>
    %c0_15 = arith.constant 0 : index
    %c0_16 = arith.constant 0 : index
    %17 = vector.load %arg7[%c0_15, %c0_16] : memref<1x32xf32, #tpu.memory_space<vmem>>, vector<1x32xf32>
    %18 = vector.broadcast %17 : vector<1x32xf32> to vector<16x32xf32>
    %19 = arith.addf %16, %18 : vector<16x32xf32>
    %20 = arith.truncf %19 : vector<16x32xf32> to vector<16x32xbf16>
    %c0_17 = arith.constant 0 : index
    %c0_18 = arith.constant 0 : index
    %c0_19 = arith.constant 0 : index
    %21 = vector.load %arg11[%c0_17, %c0_18, %c0_19] : memref<1x16x32xbf16, #tpu.memory_space<vmem>>, vector<1x16x32xbf16>
    %22 = vector.shape_cast %21 : vector<1x16x32xbf16> to vector<16x32xbf16>
    %23 = vector.shape_cast %20 : vector<16x32xbf16> to vector<1x16x32xbf16>
    tpu.vector_store %arg11[%c0_17, %c0_18, %c0_19], %23 {strides = array<i32>} : memref<1x16x32xbf16, #tpu.memory_space<vmem>>, vector<1x16x32xbf16>,
    %c0_20 = arith.constant 0 : index
    %c0_21 = arith.constant 0 : index
    %24 = vector.load %arg8[%c0_20, %c0_21] : memref<32x32xbf16, #tpu.memory_space<vmem>>, vector<32x32xbf16>
    %cst_22 = arith.constant dense<0.000000e+00> : vector<16x32xf32>
    %25 = tpu.matmul %5, %24, %cst_22 {dimension_numbers = #tpu.dot_dimension_numbers<[1], [0], [0], [1], [0, 0, 1, 1], [], []>} : vector<16x32xbf16>, vector<32x32xbf16>, vector<16x32xf32> -> vector<16x32xf32>
    %c0_23 = arith.constant 0 : index
    %c0_24 = arith.constant 0 : index
    %26 = vector.load %arg9[%c0_23, %c0_24] : memref<1x32xf32, #tpu.memory_space<vmem>>, vector<1x32xf32>
    %27 = vector.broadcast %26 : vector<1x32xf32> to vector<16x32xf32>
    %28 = arith.addf %25, %27 : vector<16x32xf32>
    %29 = arith.truncf %28 : vector<16x32xf32> to vector<16x32xbf16>
    %c0_25 = arith.constant 0 : index
    %c0_26 = arith.constant 0 : index
    %c0_27 = arith.constant 0 : index
    %30 = vector.load %arg12[%c0_25, %c0_26, %c0_27] : memref<1x16x32xbf16, #tpu.memory_space<vmem>>, vector<1x16x32xbf16>
    %31 = vector.shape_cast %30 : vector<1x16x32xbf16> to vector<16x32xbf16>
    %32 = vector.shape_cast %29 : vector<16x32xbf16> to vector<1x16x32xbf16>
    tpu.vector_store %arg12[%c0_25, %c0_26, %c0_27], %32 {strides = array<i32>} : memref<1x16x32xbf16, #tpu.memory_space<vmem>>, vector<1x16x32xbf16>,
    return
  }
  func.func @transform_0(%arg0: i32, %arg1: i32) -> (i32, i32, i32) {
    %c0_i32 = arith.constant 0 : i32
    %c0_i32_0 = arith.constant 0 : i32
    return %arg0, %arg1, %c0_i32 : i32, i32, i32
  }
  func.func @transform_1(%arg0: i32, %arg1: i32) -> (i32, i32, i32) {
    %c0_i32 = arith.constant 0 : i32
    %c0_i32_0 = arith.constant 0 : i32
    return %arg0, %arg1, %c0_i32 : i32, i32, i32
  }
  func.func @transform_2(%arg0: i32, %arg1: i32) -> (i32, i32) {
    %c0_i32 = arith.constant 0 : i32
    %c0_i32_0 = arith.constant 0 : i32
    %c0_i32_1 = arith.constant 0 : i32
    return %c0_i32, %c0_i32_0 : i32, i32
  }
  func.func @transform_3(%arg0: i32, %arg1: i32) -> (i32, i32) {
    %c0_i32 = arith.constant 0 : i32
    %c0_i32_0 = arith.constant 0 : i32
    %c0_i32_1 = arith.constant 0 : i32
    return %c0_i32, %c0_i32_0 : i32, i32
  }
  func.func @transform_4(%arg0: i32, %arg1: i32) -> (i32, i32) {
    %c0_i32 = arith.constant 0 : i32
    %c0_i32_0 = arith.constant 0 : i32
    %c0_i32_1 = arith.constant 0 : i32
    return %c0_i32, %c0_i32_0 : i32, i32
  }
  func.func @transform_5(%arg0: i32, %arg1: i32) -> (i32, i32) {
    %c0_i32 = arith.constant 0 : i32
    %c0_i32_0 = arith.constant 0 : i32
    %c0_i32_1 = arith.constant 0 : i32
    return %c0_i32, %c0_i32_0 : i32, i32
  }
  func.func @transform_6(%arg0: i32, %arg1: i32) -> (i32, i32) {
    %c0_i32 = arith.constant 0 : i32
    %c0_i32_0 = arith.constant 0 : i32
    %c0_i32_1 = arith.constant 0 : i32
    return %c0_i32, %c0_i32_0 : i32, i32
  }
  func.func @transform_7(%arg0: i32, %arg1: i32) -> (i32, i32) {
    %c0_i32 = arith.constant 0 : i32
    %c0_i32_0 = arith.constant 0 : i32
    %c0_i32_1 = arith.constant 0 : i32
    return %c0_i32, %c0_i32_0 : i32, i32
  }
  func.func @transform_8(%arg0: i32, %arg1: i32) -> (i32, i32, i32) {
    %c0_i32 = arith.constant 0 : i32
    %c0_i32_0 = arith.constant 0 : i32
    return %arg0, %arg1, %c0_i32 : i32, i32, i32
  }
  func.func @transform_9(%arg0: i32, %arg1: i32) -> (i32, i32, i32) {
    %c0_i32 = arith.constant 0 : i32
    %c0_i32_0 = arith.constant 0 : i32
    return %arg0, %arg1, %c0_i32 : i32, i32, i32
  }
  func.func @transform_10(%arg0: i32, %arg1: i32) -> (i32, i32, i32) {
    %c0_i32 = arith.constant 0 : i32
    %c0_i32_0 = arith.constant 0 : i32
    return %arg0, %arg1, %c0_i32 : i32, i32, i32
  }
}

</mosaic_0001>

<bundles_post_ra>
// kernel: tpu_custom_call.1
= control target key start
LH: loop header
LB: loop body
LE: loop exit
PB: predicated region body
PF: predicated region fallthrough
CT: control target
= control target key end

     0   :  { %s2323_s0 = inlined_call_operand.hbm [shape: f32[2,16,32], index: 0, kind: input, shape index: {}]   ;;  %s2324_s1 = inlined_call_operand.hbm [shape: f32[2,16,32], index: 1, kind: input, shape index: {}]   ;;  %s2325_s2 = inlined_call_operand.hbm [shape: bf16[32,32], index: 2, kind: input, shape index: {}]   ;;  %s2326_s3 = inlined_call_operand.hbm [shape: f32[1,32], index: 3, kind: input, shape index: {}]   ;;  %s2327_s4 = inlined_call_operand.hbm [shape: bf16[32,32], index: 4, kind: input, shape index: {}]   ;;  %s2328_s5 = inlined_call_operand.hbm [shape: f32[1,32], index: 5, kind: input, shape index: {}]   ;;  %s2329_s6 = inlined_call_operand.hbm [shape: bf16[32,32], index: 6, kind: input, shape index: {}]   ;;  %s2330_s7 = inlined_call_operand.hbm [shape: f32[1,32], index: 7, kind: input, shape index: {}]   ;;  %s2331_s8 = inlined_call_operand.hbm [shape: bf16[2,16,32], index: 8, kind: output, shape index: {0}]   ;;  %s2332_s9 = inlined_call_operand.hbm [shape: bf16[2,16,32], index: 9, kind: output, shape index: {1}]   ;;  %s2333_s10 = inlined_call_operand.hbm [shape: bf16[2,16,32], index: 10, kind: output, shape index: {2}]  }
   0x1   :  { %2345 = sst [smem:[#allocation29_spill]] %s2323_s0 }
   0x2   :  { %2346 = sst [smem:[#allocation30_spill]] %s2325_s2 }
   0x3   :  { %2347 = sst [smem:[#allocation31_spill]] %s2326_s3 }
   0x4   :  { %2348 = sst [smem:[#allocation32_spill]] %s2327_s4 }
   0x5   :  { %2349 = sst [smem:[#allocation33_spill]] %s2328_s5 }
   0x6   :  { %2350 = sst [smem:[#allocation34_spill]] %s2331_s8 }
   0x7   :  { %2351 = sst [smem:[#allocation35_spill]] %s2332_s9 }
   0x8   :  { %2352 = sst [smem:[#allocation36_spill]] %s2333_s10 }
   0x9   :  { %16 = vsyncpa [#allocation3], 0 }
   0xa   :  { %18 = vsyncpa [#allocation3 + $0x1], 0 }
   0xb   :  { %19 = vsyncpa [#allocation6], 0 }
   0xc   :  { %21 = vsyncpa [#allocation6 + $0x1], 0 }
   0xd   :  { %22 = vsyncpa [#allocation9], 0 }
   0xe   :  { %23 = vsyncpa [#allocation12], 0 }
   0xf   :  { %24 = vsyncpa [#allocation15], 0 }
  0x10   :  { %25 = vsyncpa [#allocation4], 0 }
  0x11   :  { %27 = vsyncpa [#allocation4 + $0x1], 0 }
  0x12   :  { %28 = vsyncpa [#allocation18], 0 }
  0x13   :  { %30 = vsyncpa [#allocation18 + $0x1], 0  ;;  %s1803_s13 = smov 0   ;;  %s1805_s14 = smov 0  }
  0x14   :  { %s1807_s15 = smov 0   ;;  %s1809_s16 = smov 0  }
  0x15   :  { %s1811_s17 = smov 0   ;;  %s1813_s18 = smov 0  }
  0x16 LB: > { %2353 = sst [smem:[#allocation28_spill]] %s1719_s16  ;;  %s1834_s19 = sadd.s32 4294967295, %s1727_s18   ;;  %s1727_s18 = sphi %s1813_s18, %s36_s18   ;;  %s1723_s17 = sphi %s1811_s17, %s2393_s17   ;;  %s1719_s16 = sphi %s1809_s16, %s2392_s16   ;;  %s1715_s15 = sphi %s1807_s15, %s2391_s15   ;;  %s1711_s14 = sphi %s1805_s14, %s2390_s14   ;;  %s1707_s13 = sphi %s1803_s13, %s2389_s13  }
  0x17   : > { %p1086_p0 = scmp.ge.s32.totalorder %s1727_s18, 1  ;;  %p2337_p1 = scmp.eq.s32.totalorder %s1834_s19, 0 }
  0x18   : > { %p319_p2 = scmp.lt.s32.totalorder %s1727_s18, 3  ;;  %s1729_s21 = smov [#allocation7]  }
  0x19   : > { %s331_s22 = sshll.u32 %s1729_s21, 4  ;;  %s1730_s24 = smov [#allocation8]   ;;  %s1843_s22 = int_to_ptr.vmem [resolvable:$true] %s331_s22 }
  0x1a   : > { %p1839_p3 = pnand %p1086_p0, %p319_p2  ;;  %s345_s25 = sshll.u32 %s1730_s24, 4  ;;  %s1854_s25 = int_to_ptr.vmem [resolvable:$true] %s345_s25 }
  0x1b   : > { %s1731_s26 = smov [#allocation11]   ;;  %s2356_s2 = sld [smem:[#allocation30_spill]] }
  0x1c   : > { %s2354_s20 = scalar_select %p1839_p3, 1, 0 }
  0x1d   : > { %p1219_p4 = pneg %p1839_p3  ;;  %s1856_s27 = sshll.u32 %s1731_s26, 4  ;;  %s370_s27 = int_to_ptr.vmem [resolvable:$true] %s1856_s27 }
  0x1f   : > { %p1850_p6 = pnand %p1219_p4, %p2337_p1 }
  0x21   : > { %s1337_s30 = scalar_lea.hbm %s2356_s2, 256  ;;  %p1866_p8 = pneg %p1850_p6 }
  0x22   : > { %p1338_p7 = scmp.ne.s32.totalorder %s2356_s2, %s1337_s30  ;;  %p1344_p11 = scmp.lt.u32.totalorder %s1337_s30, %s2356_s2 }
  0x24   : > { %p1340_p9 = pnand %p1866_p8, %p1338_p7 }
  0x26   : > { %p1341_p10 = pneg %p1340_p9 }
  0x28   : > { %p1346_p12 = pnand %p1344_p11, %p1341_p10 }
  0x2a   : > { %1349 = shalt.err (!%p1346_p12)
}
  0x2b   : > { %s1350_s28 = scalar_lea.vmem %s1843_s22, 256  ;;  %p1358_p4 = scmp.lt.s32.totalorder %s1843_s22, %s1843_s22 }
  0x2c   : > { %p1351_p13 = scmp.ne.s32.totalorder %s1843_s22, %s1350_s28  ;;  %p1359_p5 = scmp.lt.s32.totalorder %s1350_s28, %s1350_s28 }
  0x2e   : > { %p1353_p0 = pnand %p1351_p13, %p1866_p8  ;;  %p1360_p7 = por %p1359_p5, %p1358_p4 }
  0x30   : > { %p1354_p2 = pneg %p1353_p0 }
  0x32   : > { %p1361_p9 = pnand %p1360_p7, %p1354_p2 }
  0x34   : > { %1364 = shalt.err (!%p1361_p9)
}
  0x35   : > { %s2339_s29 = smov 64   ;;  %s1733_s30 = smov 4  }
  0x36   : > { %1222 = dma.hbm_to_vmem [thread:$0]  (!%p1850_p6), %s2356_s2, 256, %s1843_s22, [#allocation6], %s2339_s29, %s2339_s29, %s1733_s30  }
  0x37   : > { %s2358_s3 = sld [smem:[#allocation31_spill]] }
  0x3d   : > { %s1365_s28 = scalar_lea.hbm %s2358_s3, 16 }
  0x3e   : > { %p1366_p5 = scmp.ne.s32.totalorder %s2358_s3, %s1365_s28  ;;  %p1372_p12 = scmp.lt.u32.totalorder %s1365_s28, %s2358_s3 }
  0x40   : > { %p1368_p10 = pnand %p1366_p5, %p1866_p8 }
  0x42   : > { %p1369_p11 = pneg %p1368_p10 }
  0x44   : > { %p1374_p13 = pnand %p1372_p12, %p1369_p11 }
  0x46   : > { %1377 = shalt.err (!%p1374_p13)
}
  0x47   : > { %s1378_s22 = scalar_lea.vmem %s1854_s25, 16  ;;  %s1385_s9 = scalar_lea.vmem %s1854_s25, 32 }
  0x48   : > { %p1379_p0 = scmp.ne.s32.totalorder %s1854_s25, %s1378_s22  ;;  %p1386_p7 = scmp.lt.s32.totalorder %s1854_s25, %s1854_s25 }
  0x49   : > { %p1387_p9 = scmp.lt.s32.totalorder %s1385_s9, %s1378_s22 }
  0x4a   : > { %p1381_p2 = pnand %p1379_p0, %p1866_p8 }
  0x4b   : > { %p1388_p5 = por %p1387_p9, %p1386_p7 }
  0x4c   : > { %p1382_p4 = pneg %p1381_p2 }
  0x4e   : > { %p1389_p10 = pnand %p1388_p5, %p1382_p4 }
  0x50   : > { %1392 = shalt.err (!%p1389_p10)
}
  0x51   : > { %1225 = dma.hbm_to_vmem [thread:$0]  (!%p1850_p6), %s2358_s3, 16, %s1854_s25, [#allocation9]  }
  0x52   : > { %s2359_s5 = sld [smem:[#allocation33_spill]] }
  0x58   : > { %s1393_s12 = scalar_lea.hbm %s2359_s5, 16 }
  0x59   : > { %p1394_p11 = scmp.ne.s32.totalorder %s2359_s5, %s1393_s12  ;;  %p1400_p0 = scmp.lt.u32.totalorder %s1393_s12, %s2359_s5 }
  0x5b   : > { %p1396_p12 = pnand %p1394_p11, %p1866_p8 }
  0x5d   : > { %p1397_p13 = pneg %p1396_p12 }
  0x5f   : > { %p1402_p2 = pnand %p1400_p0, %p1397_p13 }
  0x61   : > { %1405 = shalt.err (!%p1402_p2)
}
  0x62   : > { %s1406_s9 = scalar_lea.vmem %s370_s27, 16  ;;  %s1413_s25 = scalar_lea.vmem %s370_s27, 32 }
  0x63   : > { %p1407_p4 = scmp.ne.s32.totalorder %s370_s27, %s1406_s9  ;;  %p1414_p5 = scmp.lt.s32.totalorder %s370_s27, %s370_s27 }
  0x64   : > { %p1415_p10 = scmp.lt.s32.totalorder %s1413_s25, %s1406_s9 }
  0x65   : > { %p1409_p7 = pnand %p1407_p4, %p1866_p8 }
  0x66   : > { %p1416_p1 = por %p1415_p10, %p1414_p5 }
  0x67   : > { %p1410_p9 = pneg %p1409_p7 }
  0x69   : > { %p1417_p3 = pnand %p1416_p1, %p1410_p9 }
  0x6b   : > { %1420 = shalt.err (!%p1417_p3)
}
  0x6c   : > { %1231 = dma.hbm_to_vmem [thread:$0]  (!%p1850_p6), %s2359_s5, 16, %s370_s27, [#allocation12]  }
  0x6d   : > { %s1734_s16 = smov [#allocation10]   ;;  %s1735_s12 = smov [#allocation13]  }
  0x6e   : > { %s355_s11 = sshll.u32 %s1734_s16, 4  ;;  %s379_s24 = sshll.u32 %s1735_s12, 4  ;;  %s356_s11 = int_to_ptr.vmem [resolvable:$true] %s355_s11  ;;  %s380_s24 = int_to_ptr.vmem [resolvable:$true] %s379_s24 }
  0x6f   : > { %s2360_s4 = sld [smem:[#allocation32_spill]] }
  0x75   : > { %s1421_s22 = scalar_lea.hbm %s2360_s4, 256 }
  0x76   : > { %p1422_p1 = scmp.ne.s32.totalorder %s2360_s4, %s1421_s22  ;;  %p1428_p12 = scmp.lt.u32.totalorder %s1421_s22, %s2360_s4 }
  0x78   : > { %p1424_p3 = pnand %p1422_p1, %p1866_p8 }
  0x7a   : > { %p1425_p11 = pneg %p1424_p3 }
  0x7c   : > { %p1430_p13 = pnand %p1428_p12, %p1425_p11 }
  0x7e   : > { %1433 = shalt.err (!%p1430_p13)
}
  0x7f   : > { %s1434_s27 = scalar_lea.vmem %s356_s11, 256  ;;  %p1442_p7 = scmp.lt.s32.totalorder %s356_s11, %s356_s11 }
  0x80   : > { %p1435_p0 = scmp.ne.s32.totalorder %s356_s11, %s1434_s27  ;;  %p1443_p9 = scmp.lt.s32.totalorder %s1434_s27, %s1434_s27 }
  0x82   : > { %p1437_p2 = pnand %p1435_p0, %p1866_p8  ;;  %p1444_p5 = por %p1443_p9, %p1442_p7 }
  0x84   : > { %p1438_p4 = pneg %p1437_p2 }
  0x86   : > { %p1445_p10 = pnand %p1444_p5, %p1438_p4 }
  0x88   : > { %1448 = shalt.err (!%p1445_p10)
}
  0x89   : > { %s2361_s10 = smov 64   ;;  %s1449_s28 = scalar_lea.hbm %s2329_s6, 256 }
  0x8a   : > { %1228 = dma.hbm_to_vmem [thread:$0]  (!%p1850_p6), %s2360_s4, 256, %s356_s11, [#allocation9], %s2361_s10, %s2361_s10, %s1733_s30  }
  0x8b   : > { %p1450_p1 = scmp.ne.s32.totalorder %s2329_s6, %s1449_s28  ;;  %p1456_p12 = scmp.lt.u32.totalorder %s1449_s28, %s2329_s6 }
  0x8d   : > { %p1452_p3 = pnand %p1450_p1, %p1866_p8 }
  0x8f   : > { %p1453_p11 = pneg %p1452_p3 }
  0x91   : > { %p1458_p13 = pnand %p1456_p12, %p1453_p11 }
  0x93   : > { %1461 = shalt.err (!%p1458_p13)
}
  0x94   : > { %s1462_s27 = scalar_lea.vmem %s380_s24, 256  ;;  %p1470_p7 = scmp.lt.s32.totalorder %s380_s24, %s380_s24 }
  0x95   : > { %p1463_p0 = scmp.ne.s32.totalorder %s380_s24, %s1462_s27  ;;  %p1471_p9 = scmp.lt.s32.totalorder %s1462_s27, %s1462_s27 }
  0x97   : > { %p1465_p2 = pnand %p1463_p0, %p1866_p8  ;;  %p1472_p5 = por %p1471_p9, %p1470_p7 }
  0x99   : > { %p1466_p4 = pneg %p1465_p2 }
  0x9b   : > { %p1473_p10 = pnand %p1472_p5, %p1466_p4 }
  0x9d   : > { %1476 = shalt.err (!%p1473_p10)
}
  0x9e   : > { %1234 = dma.hbm_to_vmem [thread:$0]  (!%p1850_p6), %s2329_s6, 256, %s380_s24, [#allocation12], %s2361_s10, %s2361_s10, %s1733_s30  }
  0x9f   : > { %s1736_s16 = smov [#allocation14]   ;;  %s1477_s22 = scalar_lea.hbm %s2330_s7, 16 }
  0xa0   : > { %s393_s12 = sshll.u32 %s1736_s16, 4  ;;  %p1478_p1 = scmp.ne.s32.totalorder %s2330_s7, %s1477_s22  ;;  %s394_s12 = int_to_ptr.vmem [resolvable:$true] %s393_s12 }
  0xa1   : > { %p1484_p12 = scmp.lt.u32.totalorder %s1477_s22, %s2330_s7 }
  0xa2   : > { %p1480_p3 = pnand %p1478_p1, %p1866_p8 }
  0xa4   : > { %p1481_p11 = pneg %p1480_p3 }
  0xa6   : > { %p1486_p13 = pnand %p1484_p12, %p1481_p11 }
  0xa8   : > { %1489 = shalt.err (!%p1486_p13)
}
  0xa9   : > { %s1490_s30 = scalar_lea.vmem %s394_s12, 16  ;;  %s1497_s24 = scalar_lea.vmem %s394_s12, 32 }
  0xaa   : > { %p1491_p0 = scmp.ne.s32.totalorder %s394_s12, %s1490_s30  ;;  %p1498_p7 = scmp.lt.s32.totalorder %s394_s12, %s394_s12 }
  0xab   : > { %p1499_p9 = scmp.lt.s32.totalorder %s1497_s24, %s1490_s30 }
  0xac   : > { %p1493_p2 = pnand %p1491_p0, %p1866_p8 }
  0xad   : > { %p1500_p5 = por %p1499_p9, %p1498_p7 }
  0xae   : > { %p1494_p4 = pneg %p1493_p2 }
  0xb0   : > { %p1501_p10 = pnand %p1500_p5, %p1494_p4 }
  0xb2   : > { %1504 = shalt.err (!%p1501_p10)
}
  0xb3   : > { %1237 = dma.hbm_to_vmem [thread:$0]  (!%p1850_p6), %s2330_s7, 16, %s394_s12, [#allocation15]  }
  0xb4   : > { %s2341_s21 = sadd.s32 4294967294, %s1727_s18   ;;  %s48_s29 = sadd.s32 1, %s1723_s17 }
  0xb5   : > { %p50_p8 = scmp.ge.s32.totalorder %s48_s29, 2  ;;  %s57_s23 = sadd.s32 1, %s1715_s15 }
  0xb6   : > { %p64_p1 = scmp.ne.s32.totalorder %s1715_s15, %s1711_s14  ;;  %p65_p3 = scmp.eq.s32.totalorder %s1727_s18, 0 }
  0xb7   : > { %s2395_s29 = smov (%p50_p8, %s48_s29), 0  ;;  %p70_p12 = scmp.ne.s32.totalorder %s1711_s14, %s1707_s13 }
  0xb8   : > { %p2001_p11 = por %p65_p3, %p64_p1  ;;  %s52_s12 = ssub.s32 %s1723_s17, %s2395_s29 }
  0xb9   : > { %p250_p6 = scmp.eq.s32.totalorder %s1834_s19, 1  ;;  %p55_p13 = scmp.eq.s32.totalorder %s52_s12, 0 }
  0xba   : > { %p2363_p0 = scmp.eq.s32.totalorder %s1834_s19, 0  ;;  %p256_p7 = scmp.eq.s32.totalorder %s2341_s21, 1 }
  0xbb   : > { %p2016_p4 = por %p250_p6, %p64_p1  ;;  %p1261_p5 = scmp.lt.s32.totalorder %s1727_s18, 2 }
  0xbc   : > { %p2012_p2 = por %p2363_p0, %p70_p12  ;;  %p2025_p9 = por %p256_p7, %p70_p12 }
  0xbd   : > { %s2365_s28 = scalar_select %p2016_p4, 1, 0 }
  0xbe   : > { %s2023_s22 = scalar_select %p55_p13, %s1715_s15, %s57_s23  }
  0xbf   : > { %s2366_s9 = scalar_select %p2025_p9, 1, 0 }
  0xc0   : > { %s404_s25 = sand.u32 1, %s1715_s15   ;;  %s2342_s8 = sshll.u32 %s1723_s17, 8 }
  0xc1   : > { %s2032_s27 = sshll.u32 %s404_s25, 4  ;;  %s2367_s0 = sld [smem:[#allocation29_spill]] }
  0xc2   : > { %s408_s11 = scalar_lea.vmem [#allocation2], %s2032_s27  ;;  %p2044_p10 = pnand %p1261_p5, %p2001_p11 }
  0xc3   : > { %s417_s23 = sshll.u32 %s408_s11, 4  ;;  %s2050_s21 = scalar_lea.sflag [#allocation3], %s404_s25  ;;  %s2048_s23 = int_to_ptr.vmem [resolvable:$true] %s417_s23 }
  0xc4   : > { %p1507_p1 = pneg %p2044_p10 }
  0xc7   : > { %s2039_s10 = scalar_lea.hbm %s2367_s0, %s2342_s8  ;;  %s1510_s11 = scalar_lea.hbm %s2367_s0, 512 }
  0xc8   : > { %s1505_s30 = scalar_lea.hbm %s2039_s10, 256  ;;  %p1511_p11 = scmp.lt.u32.totalorder %s2039_s10, %s2367_s0 }
  0xc9   : > { %p1506_p8 = scmp.ne.s32.totalorder %s2039_s10, %s1505_s30  ;;  %p1512_p6 = scmp.lt.u32.totalorder %s1510_s11, %s1505_s30 }
  0xca   : > { %p1514_p0 = scmp.lt.u32.totalorder %s1505_s30, %s2039_s10 }
  0xcb   : > { %p1508_p3 = pnand %p1507_p1, %p1506_p8  ;;  %p1513_p13 = por %p1512_p6, %p1511_p11 }
  0xcd   : > { %p1509_p12 = pneg %p1508_p3  ;;  %p1515_p7 = por %p1514_p0, %p1513_p13 }
  0xcf   : > { %p1516_p5 = pnand %p1515_p7, %p1509_p12 }
  0xd1   : > { %1519 = shalt.err (!%p1516_p5)
}
  0xd2   : > { %s1520_s25 = scalar_lea.vmem %s2048_s23, 256  ;;  %s1737_s24 = smov [#allocation2]  }
  0xd3   : > { %p1521_p8 = scmp.ne.s32.totalorder %s2048_s23, %s1520_s25  ;;  %s1525_s16 = sshll.u32 %s1737_s24, 4  ;;  %s1526_s16 = int_to_ptr.vmem [resolvable:$false] %s1525_s16 }
  0xd4   : > { %s1527_s2 = scalar_lea.vmem %s1526_s16, 512  ;;  %p1528_p4 = scmp.lt.s32.totalorder %s2048_s23, %s1526_s16 }
  0xd5   : > { %p1523_p3 = pnand %p1521_p8, %p1507_p1  ;;  %p1529_p11 = scmp.lt.s32.totalorder %s1527_s2, %s1520_s25 }
  0xd7   : > { %p1524_p9 = pneg %p1523_p3  ;;  %p1530_p6 = por %p1529_p11, %p1528_p4 }
  0xd9   : > { %p1531_p13 = pnand %p1530_p6, %p1524_p9 }
  0xdb   : > { %1534 = shalt.err (!%p1531_p13)
}
  0xdc   : > { %s1738_s8 = smov 128   ;;  %s1739_s30 = smov 8  }
  0xdd   : > { %1241 = dma.hbm_to_vmem [thread:$0]  (!%p2044_p10), %s2039_s10, 256, %s2048_s23, %s2050_s21, %s1738_s8, %s1738_s8, %s1739_s30  }
  0xde   : > { %s2369_s11 = sshll.u32 %s1723_s17, 8  ;;  %s431_s2 = scalar_lea.vmem [#allocation5], %s2032_s27 }
  0xdf   : > { %s2086_s16 = scalar_lea.hbm %s2324_s1, %s2369_s11  ;;  %s440_s0 = sshll.u32 %s431_s2, 4  ;;  %s2090_s0 = int_to_ptr.vmem [resolvable:$true] %s440_s0 }
  0xe0   : > { %s427_s3 = sand.u32 1, %s1727_s18   ;;  %s1535_s5 = scalar_lea.hbm %s2086_s16, 256 }
  0xe1   : > { %s2092_s4 = scalar_lea.sflag [#allocation6], %s427_s3  ;;  %p1536_p4 = scmp.ne.s32.totalorder %s2086_s16, %s1535_s5 }
  0xe2   : > { %s1540_s23 = scalar_lea.hbm %s2324_s1, 512  ;;  %p1541_p0 = scmp.lt.u32.totalorder %s2086_s16, %s2324_s1 }
  0xe3   : > { %p1538_p9 = pnand %p1536_p4, %p1507_p1  ;;  %p1542_p7 = scmp.lt.u32.totalorder %s1540_s23, %s1535_s5 }
  0xe4   : > { %p1544_p8 = scmp.lt.u32.totalorder %s1535_s5, %s2086_s16 }
  0xe5   : > { %p1539_p12 = pneg %p1538_p9  ;;  %p1543_p5 = por %p1542_p7, %p1541_p0 }
  0xe7   : > { %p1545_p3 = por %p1544_p8, %p1543_p5 }
  0xe9   : > { %p1546_p11 = pnand %p1545_p3, %p1539_p12 }
  0xeb   : > { %1549 = shalt.err (!%p1546_p11)
}
  0xec   : > { %s1550_s3 = scalar_lea.vmem %s2090_s0, 256  ;;  %s1740_s27 = smov [#allocation5]  }
  0xed   : > { %p1551_p6 = scmp.ne.s32.totalorder %s2090_s0, %s1550_s3  ;;  %s1555_s24 = sshll.u32 %s1740_s27, 4  ;;  %s1556_s24 = int_to_ptr.vmem [resolvable:$false] %s1555_s24 }
  0xee   : > { %s1557_s2 = scalar_lea.vmem %s1556_s24, 512  ;;  %p1558_p9 = scmp.lt.s32.totalorder %s2090_s0, %s1556_s24 }
  0xef   : > { %p1553_p13 = pnand %p1551_p6, %p1507_p1  ;;  %p1559_p0 = scmp.lt.s32.totalorder %s1557_s2, %s1550_s3 }
  0xf1   : > { %p1554_p4 = pneg %p1553_p13  ;;  %p1560_p7 = por %p1559_p0, %p1558_p9 }
  0xf3   : > { %p1561_p5 = pnand %p1560_p7, %p1554_p4 }
  0xf5   : > { %1564 = shalt.err (!%p1561_p5)
}
  0xf6   : > { %1244 = dma.hbm_to_vmem [thread:$0]  (!%p2044_p10), %s2086_s16, 256, %s2090_s0, %s2092_s4, %s1738_s8, %s1738_s8, %s1739_s30  }
  0xf7   : > { %p2370_p1 = scmp.ne.s32.totalorder %s2354_s20, 0 }
  0xf8   : > { %s2124_s5 = sand.u32 (!%p2370_p1), 1, %s1711_s14  }
  0xf9   : > { %452 = sbr.rel (%p2370_p1) target bundleno = 570 (0x23a), region = 52  ;;  %s1101_s21 = sshll.u32 (!%p2370_p1), %s2124_s5, 4 }
  0xfa   : > { %s455_s10 = scalar_lea.sflag (!%p2370_p1), [#allocation3], %s2124_s5  ;;  %s458_s23 = scalar_lea.vmem (!%p2370_p1), [#allocation2], %s1101_s21 }
 0x100   : > { %1674 = dma.done.wait (%p2012_p2), %s455_s10, 256  }
 0x101   : > { %1676 = vsyncadd (%p2012_p2), %s455_s10, 4294967040  ;;  %s2344_s0 = sand.u32 1, %s1834_s19   ;;  %s2135_s20 = scalar_lea.vmem [#allocation5], %s1101_s21 }
 0x102   : > { %s464_s4 = scalar_lea.sflag [#allocation6], %s2344_s0 }
 0x103   : > { %1678 = dma.done.wait (%p2012_p2), %s464_s4, 256  }
 0x104   : > { %1680 = vsyncadd (%p2012_p2), %s464_s4, 4294967040  ;;  %p2371_p10 = scmp.eq.s32.totalorder %s1834_s19, 0 }
 0x106   : > { %1682 = dma.done.wait (%p2371_p10), [#allocation6], 256   ;;  %p2372_p12 = pmov %p2371_p10 }
 0x107   : > { %p2373_p8 = pmov %p2371_p10 }
 0x108   : > { %1684 = vsyncadd (%p2372_p12), [#allocation6], 4294967040 }
 0x109   : > { %1686 = dma.done.wait (%p2373_p8), [#allocation9], 272   ;;  %p2374_p3 = pmov %p2373_p8 }
 0x10b   : > { %1688 = vsyncadd (%p2374_p3), [#allocation9], 4294967024  ;;  %p2375_p11 = pmov %p2374_p3 }
 0x10c   : > { %p2376_p6 = pmov %p2374_p3 }
 0x10d   : > { %1690 = dma.done.wait (%p2375_p11), [#allocation12], 272  }
 0x10e   : > { %1692 = vsyncadd (%p2376_p6), [#allocation12], 4294967024  ;;  %p2377_p2 = pmov %p2374_p3 }
 0x110   : > { %1694 = dma.done.wait (%p2377_p2), [#allocation15], 16   ;;  %p2378_p13 = pmov %p2377_p2 }
 0x111   : > { %v1741_v0 = vmov 0.0   ;;  %vm1742_vm0 = vmmov 0   ;;  %v1331_v1 = vld [vmem:[#allocation7] sm:$0xff]   ;;  %v1332_v2 = vld [vmem:[#allocation7 + $0x8] sm:$0xff]   ;;  %v1333_v3 = vld [vmem:[#allocation10] sm:$0xff]   ;;  %vm578_vm1 = vcmask 261120  }
 0x112   : > { %1696 = vsyncadd (%p2378_p13), [#allocation15], 4294967280  ;;  %1161 = vmatprep.subr.bf16.mxu0 %v1741_v0  ;;  %1169 = vmatprep.subr.bf16.mxu1 %v1741_v0  ;;  %v549_v4 = vld [vmem:[%s458_s23] sm:$0xff]  ;;  %v550_v5 = vld [vmem:[%s458_s23 + $0x8] sm:$0xff]  ;;  %s2379_s26 = sld [smem:[#allocation28_spill]]  ;;  %s2163_s12 = sshll.u32 %s2124_s5, 3 }
 0x113   : > { %1165 = vmatprep.mubr.msk.bf16.mxu0 %vm1742_vm0, %v1741_v0  ;;  %1173 = vmatprep.mubr.msk.bf16.mxu1 %vm1742_vm0, %v1741_v0  ;;  %v1334_v6 = vld [vmem:[#allocation13] sm:$0xff]   ;;  %v551_v7 = vpack.c.bf16 %v550_v5, %v549_v4  ;;  %v1335_v8 = vld [vmem:[#allocation10 + $0x8] sm:$0xff]   ;;  %v1336_v12 = vld [vmem:[#allocation13 + $0x8] sm:$0xff]   ;;  %vm631_vm2 = vcmask 257024   ;;  %s528_s8 = scalar_lea.vmem [#allocation16], %s2163_s12  ;;  %s2170_s11 = scalar_lea.vmem [#allocation17], %s2163_s12 }
 0x114   : > { %1162 = vmatpush3.bf16.msra.mxu0 %v1331_v1  ;;  %1170 = vmatpush3.bf16.msra.mxu1 %v1333_v3  ;;  %v552_v9 = vld [vmem:[%s2135_s20] sm:$0xff]  ;;  %v553_v10 = vld [vmem:[%s2135_s20 + $0x8] sm:$0xff]  ;;  %s811_s30 = sshll.u32 %s528_s8, 4  ;;  %s829_s25 = sshll.u32 %s2170_s11, 4  ;;  %s2180_s30 = int_to_ptr.vmem [resolvable:$true] %s811_s30  ;;  %s2193_s25 = int_to_ptr.vmem [resolvable:$true] %s829_s25 }
 0x115   : > { %1163 = vmatprep.subr.bf16.mxu0 %v1741_v0  ;;  %1171 = vmatprep.subr.bf16.mxu1 %v1741_v0  ;;  %v554_v11 = vpack.c.bf16 %v553_v10, %v552_v9  ;;  %v1112_v13 = vld [vmem:[#allocation8] ss:$0 sm:$0xff]  ;;  %v1118_v15 = vld [vmem:[#allocation11] ss:$0 sm:$0xff]  ;;  %s2380_s24 = sld [smem:[#allocation34_spill]]  ;;  %s2381_s23 = sld [smem:[#allocation35_spill]] }
 0x116   : > { %v2182_v30 = vld [vmem:[#allocation14] ss:$0 sm:$0xff]  ;;  %p2382_p9 = scmp.ne.s32.totalorder %s2365_s28, 0  ;;  %s1743_s3 = smov [#allocation16]  }
 0x117   : > { %s1569_s27 = sshll.u32 %s1743_s3, 4  ;;  %s1570_s27 = int_to_ptr.vmem [resolvable:$false] %s1569_s27 }
 0x118   : > { %1164 = vmatpush3.bf16.msra.mxu0 %v1332_v2  ;;  %1172 = vmatpush3.bf16.msra.mxu1 %v1335_v8  ;;  %s2167_s16 = sshll.u32 %s2379_s26, 7  ;;  %s1565_s26 = scalar_lea.vmem %s2180_s30, 128 }
 0x119   : > { %1177 = vmatprep.subr.bf16.mxu0 %v1741_v0  ;;  %p1566_p4 = scmp.ne.s32.totalorder %s2180_s30, %s1565_s26  ;;  %p1572_p5 = scmp.lt.s32.totalorder %s2180_s30, %s1570_s27 }
 0x11b   : > { %1166 = vmatmul.mubr.msk.bf16.vlgmr.msra.gmra.mrb[0].mxu0 %vm578_vm1, %v551_v7  ;;  %1174 = vmatmul.mubr.msk.bf16.vlgmr.msra.gmra.mrb[0].mxu1 %vm578_vm1, %v554_v11  ;;  %s2178_s2 = scalar_lea.hbm %s2380_s24, %s2167_s16  ;;  %s2191_s4 = scalar_lea.hbm %s2381_s23, %s2167_s16 }
 0x11c   : > { %1178 = vmatpush3.bf16.msra.mxu0 %v1334_v6  ;;  %1181 = vmatprep.mubr.msk.bf16.mxu0 %vm1742_vm0, %v1741_v0  ;;  %p1567_p0 = pnand %p1566_p4, %p2382_p9 }
 0x11d   : > { %1179 = vmatprep.subr.bf16.mxu0 %v1741_v0 }
 0x11e   : > { %p1568_p7 = pneg %p1567_p0 }
 0x120   : > { %1180 = vmatpush3.bf16.msra.mxu0 %v1336_v12 }
 0x123   : > { %1182 = vmatmul.mubr.msk.bf16.vlgmr.msra.gmra.mrb[4].mxu0 %vm578_vm1, %v554_v11 }
 0x1ee   : > { %v616_v14 = vpop.f32.mrb[0].mxu0  ;;  %v694_v19 = vpop.f32.mrb[0].mxu1 }
 0x1ef   : > { %v617_v16 = vadd.f32 %v1112_v13, %v616_v14  ;;  %v1167_v17 = vpop.f32.mrb[1].mxu0  ;;  %v695_v23 = vadd.f32 %v1118_v15, %v694_v19  ;;  %v1175_v24 = vpop.f32.mrb[1].mxu1 }
 0x1f0   : > { %v619_v18 = vpop.f32.mrb[2].mxu0  ;;  %v697_v25 = vpop.f32.mrb[2].mxu1 }
 0x1f1   : > { %v1143_v20 = vpack.c.bf16 %v617_v16, %v617_v16  ;;  %v620_v21 = vadd.f32 %v1112_v13, %v619_v18  ;;  %v1168_v22 = vpop.f32.mrb[3].mxu0  ;;  %v1145_v27 = vpack.c.bf16 %v695_v23, %v695_v23  ;;  %v698_v28 = vadd.f32 %v1118_v15, %v697_v25  ;;  %v1176_v29 = vpop.f32.mrb[3].mxu1 }
 0x1f3   : > { %632 = vst.msk [vmem:[%s528_s8] sm:$0xf] %vm631_vm2, %v1143_v20  ;;  %v1144_v26 = vpack.c.bf16 %v620_v21, %v620_v21  ;;  %709 = vst.msk [vmem:[%s2170_s11] sm:$0xf] %vm631_vm2, %v1145_v27  ;;  %v1146_v31 = vpack.c.bf16 %v698_v28, %v698_v28 }
 0x1f5   : > { %633 = vst.msk [vmem:[%s528_s8 + $0x4] sm:$0xf] %vm631_vm2, %v1144_v26  ;;  %s1571_s8 = scalar_lea.vmem %s1570_s27, 256 }
 0x1f6   : > { %v768_v32 = vpop.f32.mrb[4].mxu0  ;;  %p1573_p1 = scmp.lt.s32.totalorder %s1571_s8, %s1565_s26 }
 0x1f8   : > { %p1574_p10 = por %p1573_p1, %p1572_p5 }
 0x1fa   : > { %p1575_p12 = pnand %p1574_p10, %p1568_p7 }
 0x1fc   : > { %1578 = shalt.err (!%p1575_p12)
}
 0x1fd   : > { %s1579_s21 = scalar_lea.hbm %s2178_s2, 128  ;;  %s1583_s3 = scalar_lea.hbm %s2380_s24, 256 }
 0x1fe   : > { %p1580_p8 = scmp.ne.s32.totalorder %s2178_s2, %s1579_s21  ;;  %p1584_p6 = scmp.lt.u32.totalorder %s2178_s2, %s2380_s24 }
 0x1ff   : > { %p1585_p2 = scmp.lt.u32.totalorder %s1583_s3, %s1579_s21  ;;  %p1587_p4 = scmp.lt.u32.totalorder %s1579_s21, %s2178_s2 }
 0x200   : > { %p1581_p3 = pnand %p1580_p8, %p2382_p9 }
 0x201   : > { %p1586_p13 = por %p1585_p2, %p1584_p6 }
 0x202   : > { %p1582_p11 = pneg %p1581_p3 }
 0x203   : > { %p1588_p0 = por %p1587_p4, %p1586_p13 }
 0x205   : > { %p1589_p7 = pnand %p1588_p0, %p1582_p11 }
 0x207   : > { %1592 = shalt.err (!%p1589_p7)
}
 0x208   : > { %s1744_s26 = smov 64   ;;  %s1745_s0 = smov 4   ;;  %710 = vst.msk [vmem:[%s2170_s11 + $0x4] sm:$0xf] %vm631_vm2, %v1146_v31  ;;  %v769_v33 = vadd.f32 %v2182_v30, %v768_v32  ;;  %v1183_v34 = vpop.f32.mrb[5].mxu0 }
 0x209   : > { %s2383_s20 = scalar_lea.sflag [#allocation4], %s2124_s5  ;;  %s2226_s8 = scalar_lea.vmem [#allocation19], %s2163_s12  ;;  %v771_v35 = vpop.f32.mrb[6].mxu0 }
 0x20a   : > { %1213 = dma.vmem_to_hbm [thread:$0]  (%p2382_p9), %s2180_s30, 128, %s2178_s2, %s2383_s20, %s1744_s26, %s1744_s26, %s1745_s0  }
 0x20b   : > { %s847_s21 = sshll.u32 %s2226_s8, 4  ;;  %s2384_s10 = sand.u32 1, %s1834_s19   ;;  %s2263_s21 = int_to_ptr.vmem [resolvable:$true] %s847_s21 }
 0x20c   : > { %s2231_s3 = scalar_lea.sflag [#allocation18], %s2384_s10  ;;  %s1593_s27 = scalar_lea.vmem %s2193_s25, 128 }
 0x20d   : > { %p1594_p5 = scmp.ne.s32.totalorder %s2193_s25, %s1593_s27  ;;  %s1746_s5 = smov [#allocation17]  }
 0x20e   : > { %s1597_s30 = sshll.u32 %s1746_s5, 4  ;;  %s1598_s30 = int_to_ptr.vmem [resolvable:$false] %s1597_s30 }
 0x20f   : > { %p1595_p1 = pnand %p1594_p5, %p2382_p9  ;;  %s1599_s11 = scalar_lea.vmem %s1598_s30, 256 }
 0x210   : > { %p1600_p12 = scmp.lt.s32.totalorder %s2193_s25, %s1598_s30  ;;  %p1601_p8 = scmp.lt.s32.totalorder %s1599_s11, %s1593_s27 }
 0x211   : > { %p1596_p10 = pneg %p1595_p1 }
 0x212   : > { %p1602_p3 = por %p1601_p8, %p1600_p12 }
 0x214   : > { %p1603_p11 = pnand %p1602_p3, %p1596_p10 }
 0x216   : > { %1606 = shalt.err (!%p1603_p11)
}
 0x217   : > { %s1607_s19 = scalar_lea.hbm %s2191_s4, 128  ;;  %s1611_s20 = scalar_lea.hbm %s2381_s23, 256 }
 0x218   : > { %p1608_p6 = scmp.ne.s32.totalorder %s2191_s4, %s1607_s19  ;;  %p1612_p4 = scmp.lt.u32.totalorder %s2191_s4, %s2381_s23 }
 0x219   : > { %p1613_p0 = scmp.lt.u32.totalorder %s1611_s20, %s1607_s19  ;;  %p1615_p5 = scmp.lt.u32.totalorder %s1607_s19, %s2191_s4 }
 0x21a   : > { %p1609_p2 = pnand %p1608_p6, %p2382_p9 }
 0x21b   : > { %p1614_p7 = por %p1613_p0, %p1612_p4 }
 0x21c   : > { %p1610_p13 = pneg %p1609_p2 }
 0x21d   : > { %p1616_p1 = por %p1615_p5, %p1614_p7 }
 0x21f   : > { %p1617_p10 = pnand %p1616_p1, %p1610_p13 }
 0x221   : > { %1620 = shalt.err (!%p1617_p10)
}
 0x222   : > { %1214 = dma.vmem_to_hbm [thread:$0]  (%p2382_p9), %s2193_s25, 128, %s2191_s4, %s2231_s3, %s1744_s26, %s1744_s26, %s1745_s0   ;;  %v1147_v36 = vpack.c.bf16 %v769_v33, %v769_v33  ;;  %v772_v37 = vadd.f32 %v2182_v30, %v771_v35  ;;  %v1184_v38 = vpop.f32.mrb[7].mxu0 }
 0x223   : > { %s2385_s11 = sld [smem:[#allocation36_spill]]  ;;  %s1621_s25 = scalar_lea.vmem %s2263_s21, 128 }
 0x224   : > { %783 = vst.msk [vmem:[%s2226_s8] sm:$0xf] %vm631_vm2, %v1147_v36  ;;  %v1148_v39 = vpack.c.bf16 %v772_v37, %v772_v37  ;;  %p1622_p12 = scmp.ne.s32.totalorder %s2263_s21, %s1621_s25  ;;  %s1747_s4 = smov [#allocation19]  }
 0x225   : > { %s1625_s12 = sshll.u32 %s1747_s4, 4  ;;  %s1626_s12 = int_to_ptr.vmem [resolvable:$false] %s1625_s12 }
 0x226   : > { %784 = vst.msk [vmem:[%s2226_s8 + $0x4] sm:$0xf] %vm631_vm2, %v1148_v39  ;;  %p1623_p8 = pnand %p1622_p12, %p2382_p9  ;;  %s1627_s2 = scalar_lea.vmem %s1626_s12, 256 }
 0x227   : > { %p1628_p11 = scmp.lt.s32.totalorder %s2263_s21, %s1626_s12  ;;  %p1629_p6 = scmp.lt.s32.totalorder %s1627_s2, %s1621_s25 }
 0x228   : > { %p1624_p3 = pneg %p1623_p8 }
 0x229   : > { %s2269_s19 = scalar_lea.hbm %s2385_s11, %s2167_s16  ;;  %p1630_p2 = por %p1629_p6, %p1628_p11 }
 0x22b   : > { %p1631_p13 = pnand %p1630_p2, %p1624_p3 }
 0x22d   : > { %1634 = shalt.err (!%p1631_p13)
}
 0x22e   : > { %s1635_s16 = scalar_lea.hbm %s2269_s19, 128  ;;  %s1639_s10 = scalar_lea.hbm %s2385_s11, 256 }
 0x22f   : > { %p1636_p4 = scmp.ne.s32.totalorder %s2269_s19, %s1635_s16  ;;  %p1640_p5 = scmp.lt.u32.totalorder %s2269_s19, %s2385_s11 }
 0x230   : > { %p1641_p1 = scmp.lt.u32.totalorder %s1639_s10, %s1635_s16  ;;  %p1643_p12 = scmp.lt.u32.totalorder %s1635_s16, %s2269_s19 }
 0x231   : > { %p1637_p0 = pnand %p1636_p4, %p2382_p9 }
 0x232   : > { %p1642_p10 = por %p1641_p1, %p1640_p5 }
 0x233   : > { %p1638_p7 = pneg %p1637_p0 }
 0x234   : > { %p1644_p8 = por %p1643_p12, %p1642_p10 }
 0x236   : > { %p1645_p3 = pnand %p1644_p8, %p1638_p7 }
 0x238   : > { %1648 = shalt.err (!%p1645_p3)
}
 0x239   : > { %1215 = dma.vmem_to_hbm [thread:$0]  (%p2382_p9), %s2263_s21, 128, %s2269_s19, %s2231_s3, %s1744_s26, %s1744_s26, %s1745_s0  }
 0x23a PF: > { %s862_s30 = sand.u32 1, %s1707_s13   ;;  %p2386_p11 = scmp.ne.s32.totalorder %s2366_s9, 0 }
 0x23b   : > { %p2387_p6 = scmp.ge.s32.totalorder %s1727_s18, 2  ;;  %s863_s25 = scalar_lea.sflag [#allocation4], %s862_s30 }
 0x23d   : > { %p1246_p2 = pnand %p2387_p6, %p2386_p11 }
 0x23f   : > { %1698 = dma.done.wait (!%p1246_p2), %s863_s25, 128  }
 0x240   : > { %1700 = vsyncadd (!%p1246_p2), %s863_s25, 4294967168  ;;  %s2388_s28 = sadd.s32 4294967294, %s1727_s18  }
 0x241   : > { %s871_s4 = sand.u32 1, %s2388_s28  }
 0x242   : > { %s872_s12 = scalar_lea.sflag [#allocation18], %s871_s4 }
 0x243   : > { %1702 = dma.done.wait (!%p1246_p2), %s872_s12, 256  }
 0x244   : > { %1704 = vsyncadd (!%p1246_p2), %s872_s12, 4294967040  ;;  %s36_s18 = sadd.s32 1, %s1727_s18   ;;  %s2389_s13 = smov %s1711_s14 }
 0x245   : > { %p33_p9 = scmp.ge.s32.totalorder %s36_s18, 4   ;;  %s2390_s14 = smov %s1715_s15 }
 0x246   : > { %s2391_s15 = smov %s2023_s22  ;;  %s2392_s16 = smov %s1723_s17 }
 0x247   : > { %s2393_s17 = smov %s2395_s29  ;;  %35 = sbr.rel (!%p33_p9) target bundleno = 22 (0x16), region = 166 }
 0x24e   :  { %886 = vsyncpa [#allocation3], 1 }
 0x24f   :  { %888 = vsyncpa [#allocation3 + $0x1], 1 }
 0x250   :  { %889 = vsyncpa [#allocation6], 1 }
 0x251   :  { %891 = vsyncpa [#allocation6 + $0x1], 1 }
 0x252   :  { %892 = vsyncpa [#allocation9], 1 }
 0x253   :  { %893 = vsyncpa [#allocation12], 1 }
 0x254   :  { %894 = vsyncpa [#allocation15], 1 }
 0x255   :  { %895 = vsyncpa [#allocation4], 1 }
 0x256   :  { %897 = vsyncpa [#allocation4 + $0x1], 1 }
 0x257   :  { %898 = vsyncpa [#allocation18], 1 }
 0x258   :  { %900 = vsyncpa [#allocation18 + $0x1], 1 }

</bundles_post_ra>
